<compile_context>
chip_gen: v5e
topology: v5e:2x2
jax: 0.10.0
libtpu: 0.0.40
codegen_flags: <defaults>
</compile_context>

<pallas_src>
import functools

import jax
import jax.numpy as jnp
from jax.experimental import pallas as pl
from jax.experimental.pallas import tpu as pltpu


def _factorized_reduce_kernel(a_ref, w_ref, gamma_ref, beta_ref, o_ref,
                              sum_ref, sumsq_ref, *, inv_count, eps):
    """Two-pass fused ReLU + block-diag 1x1 convs + training-mode BatchNorm.

    grid = (2, num_lane_tiles): axis 0 is the pass (0 = stats, 1 = apply),
    axis 1 walks lane tiles of the (2*Cin, N*Hout*Wout) input.

    a_ref     : (2*Cin, LT)   rows = (phase, cin), lanes = (n, i, j)
    w_ref     : (Cout, 2*Cin) block-diagonal [[W1, 0], [0, W2]]
    gamma_ref : (Cout, 1)     BN affine weight
    beta_ref  : (Cout, 1)     BN affine bias
    o_ref     : (Cout, LT)    output lane tile (written in the apply pass only)
    sum_ref   : (Cout, 1)     VMEM scratch: running per-channel sum(y)
    sumsq_ref : (Cout, 1)     VMEM scratch: running per-channel sum(y*y)
    """
    p = pl.program_id(0)
    t = pl.program_id(1)

    # ReLU commutes with the phase subsampling done in the wrapper, so it is
    # applied to the already-subsampled tile.  One small (Cout x 2*Cin) matmul
    # performs both 1x1 convs AND the channel concat.  (At real DARTS channel
    # counts this fills the MXU; at the toy test shape it is one tiny vmatmul.)
    xr = jnp.maximum(a_ref[...], 0.0)                       # (2*Cin, LT)
    y = jnp.dot(w_ref[...], xr,
                preferred_element_type=jnp.float32)          # (Cout, LT)

    @pl.when(jnp.logical_and(p == 0, t == 0))
    def _():
        sum_ref[...] = jnp.zeros_like(sum_ref)
        sumsq_ref[...] = jnp.zeros_like(sumsq_ref)

    @pl.when(p == 0)  # stats pass: accumulate batch statistics per channel
    def _():
        sum_ref[...] += jnp.sum(y, axis=1, keepdims=True)
        sumsq_ref[...] += jnp.sum(y * y, axis=1, keepdims=True)

    @pl.when(p == 1)  # apply pass: normalize + affine, single lane-dense store
    def _():
        mean = sum_ref[...] * inv_count
        # E[y^2] - E[y]^2, clamped at 0 against round-off.  Adequate at f32
        # for BN statistics; switch to a centered pass if tolerances tighten.
        var = jnp.maximum(sumsq_ref[...] * inv_count - mean * mean, 0.0)
        scale = gamma_ref[...] * jax.lax.rsqrt(var + eps)
        shift = beta_ref[...] - mean * scale
        o_ref[...] = y * scale + shift


def _pick_lane_tile(total_lanes):
    """Largest lane-tile (multiple of 128, capped at 1024) dividing the total.

    Exact division keeps the BN statistics free of padded-lane garbage and the
    stores unmasked.  Falls back to a single full-width block otherwise.
    """
    for cand in (1024, 512, 256, 128):
        if total_lanes % cand == 0:
            return cand
    return total_lanes


def factorized_reduce_forward(x_nchw, w1, w2, gamma, beta, *, eps=1e-5):
    """FactorizedReduce forward.

    x_nchw : (N, Cin, H, W) float32, H and W even
    w1, w2 : (Cout//2, Cin)   == torch convN.weight[:, :, 0, 0]
    gamma, beta : (Cout,)     BN affine parameters
    returns (N, Cout, H//2, W//2)
    """
    N, Cin, H, W = x_nchw.shape
    Co2, _ = w1.shape
    Cout = 2 * Co2
    assert H % 2 == 0 and W % 2 == 0, "FactorizedReduce needs even spatial dims"
    Hout, Wout = H // 2, W // 2
    HWo = Hout * Wout
    L = N * HWo                                   # total output lanes

    x = x_nchw.astype(jnp.float32)
    # Phase extraction (stride-2 taps at (0,0) and (1,1)) + layout plumbing in
    # the wrapper: one fused XLA copy producing rows=(phase,cin), lanes=(n,i,j).
    p0 = x[:, :, 0::2, 0::2]                      # conv1 taps
    p1 = x[:, :, 1::2, 1::2]                      # conv2 taps (the [1:,1:] shift)
    a = (jnp.concatenate([p0, p1], axis=1)        # (N, 2*Cin, Hout, Wout)
         .transpose(1, 0, 2, 3)                   # (2*Cin, N, Hout, Wout)
         .reshape(2 * Cin, L))                    # (2*Cin, N*HWo) lane-dense

    # Fuse conv1/conv2 + channel concat into one block-diagonal weight.
    z = jnp.zeros((Co2, Cin), jnp.float32)
    wblk = jnp.concatenate(
        [jnp.concatenate([w1.astype(jnp.float32), z], axis=1),
         jnp.concatenate([z, w2.astype(jnp.float32)], axis=1)],
        axis=0)                                   # (Cout, 2*Cin)

    gamma2 = gamma.astype(jnp.float32).reshape(Cout, 1)
    beta2 = beta.astype(jnp.float32).reshape(Cout, 1)

    LT = _pick_lane_tile(L)
    T = L // LT if L % LT == 0 else 1

    kernel = functools.partial(_factorized_reduce_kernel,
                               inv_count=1.0 / L, eps=eps)

    # TODO(synk): BatchNorm running_mean/running_var updates are module state
    # (training-mode side effect), not part of the forward output; not modeled.
    # TODO(synk): on v7x the lane-tile axis could be split across both
    # TensorCores ("parallel") with a cross-core combine of the BN partial
    # sums; kept sequential here because the accumulators are shared.
    y = pl.pallas_call(
        kernel,
        out_shape=jax.ShapeDtypeStruct((Cout, L), jnp.float32),
        grid=(2, T),                               # (pass, lane tiles)
        in_specs=[
            pl.BlockSpec((2 * Cin, LT), lambda p, t: (0, t)),
            pl.BlockSpec((Cout, 2 * Cin), lambda p, t: (0, 0)),
            pl.BlockSpec((Cout, 1), lambda p, t: (0, 0)),
            pl.BlockSpec((Cout, 1), lambda p, t: (0, 0)),
        ],
        # Stats pass (p=0) pins the output block to tile 0 so nothing is
        # written back to HBM until the apply pass walks the tiles.
        out_specs=pl.BlockSpec((Cout, LT), lambda p, t: (0, t * p)),
        scratch_shapes=[pltpu.VMEM((Cout, 1), jnp.float32),   # sum(y)
                        pltpu.VMEM((Cout, 1), jnp.float32)],  # sum(y*y)
        compiler_params=pltpu.CompilerParams(
            dimension_semantics=("arbitrary", "arbitrary")),
    )(a, wblk, gamma2, beta2)

    # Back to NCHW.  TODO(synk): drop this transpose if the downstream
    # consumer accepts (Cout, N, Hout, Wout) / channels-first-over-batch.
    return jnp.transpose(y.reshape(Cout, N, Hout, Wout), (1, 0, 2, 3))


# ----------------------------------------------------------------------------
# Pure-JAX reference (mirrors the PyTorch module) for correctness checking.
# ----------------------------------------------------------------------------
def factorized_reduce_reference(x, w1, w2, gamma, beta, *, eps=1e-5):
    xr = jnp.maximum(x, 0.0)
    dn = ("NCHW", "OIHW", "NCHW")
    y1 = jax.lax.conv_general_dilated(
        xr, w1[:, :, None, None], window_strides=(2, 2),
        padding=[(0, 0), (0, 0)], dimension_numbers=dn)
    y2 = jax.lax.conv_general_dilated(
        xr[:, :, 1:, 1:], w2[:, :, None, None], window_strides=(2, 2),
        padding=[(0, 0), (0, 0)], dimension_numbers=dn)
    y = jnp.concatenate([y1, y2], axis=1)
    mean = jnp.mean(y, axis=(0, 2, 3), keepdims=True)
    var = jnp.mean((y - mean) ** 2, axis=(0, 2, 3), keepdims=True)  # biased
    yhat = (y - mean) * jax.lax.rsqrt(var + eps)
    return yhat * gamma[None, :, None, None] + beta[None, :, None, None]


if __name__ == "__main__":
    # Module config: channel_in=4, channel_out=8; input (2, 4, 16, 16).
    N, Cin, Cout, H, W = 2, 4, 8, 16, 16

    key = jax.random.PRNGKey(0)
    k_x, k_w1, k_w2, k_g, k_b = jax.random.split(key, 5)
    x = jax.random.normal(k_x, (N, Cin, H, W), dtype=jnp.float32)
    w1 = jax.random.normal(k_w1, (Cout // 2, Cin), dtype=jnp.float32) * 0.3
    w2 = jax.random.normal(k_w2, (Cout // 2, Cin), dtype=jnp.float32) * 0.3
    gamma = 1.0 + 0.1 * jax.random.normal(k_g, (Cout,), dtype=jnp.float32)
    beta = 0.1 * jax.random.normal(k_b, (Cout,), dtype=jnp.float32)

    out = factorized_reduce_forward(x, w1, w2, gamma, beta)
    out = jax.block_until_ready(out)

    ref = factorized_reduce_reference(x, w1, w2, gamma, beta)

    assert out.shape == ref.shape == (N, Cout, H // 2, W // 2), (out.shape, ref.shape)
    assert jnp.allclose(out, ref, rtol=1e-4, atol=1e-4), \
        float(jnp.max(jnp.abs(out - ref)))

    print("KERNEL_OK")
</pallas_src>

<mosaic_0001>
module attributes {stable_mosaic.version = 11 : i64} {
  func.func @_factorized_reduce_kernel(%arg0: i32, %arg1: i32, %arg2: memref<8x128xf32, #tpu.memory_space<vmem>>, %arg3: memref<8x8xf32, #tpu.memory_space<vmem>>, %arg4: memref<8x1xf32, #tpu.memory_space<vmem>>, %arg5: memref<8x1xf32, #tpu.memory_space<vmem>>, %arg6: memref<8x128xf32, #tpu.memory_space<vmem>>, %arg7: memref<8x1xf32, #tpu.memory_space<vmem>>, %arg8: memref<8x1xf32, #tpu.memory_space<vmem>>) attributes {dimension_semantics = [#tpu.dimension_semantics<arbitrary>, #tpu.dimension_semantics<arbitrary>], iteration_bounds = array<i64: 2, 1>, scalar_prefetch = 0 : i64, scratch_operands = 2 : i64, tpu.core_type = #tpu.core_type<tc>, window_params = [{transform_indices = @transform_0, window_bounds = array<i64: 8, 128>}, {pipeline_mode = #tpu.pipeline_mode<synchronous>, transform_indices = @transform_1, window_bounds = array<i64: 8, 8>}, {pipeline_mode = #tpu.pipeline_mode<synchronous>, transform_indices = @transform_2, window_bounds = array<i64: 8, 1>}, {pipeline_mode = #tpu.pipeline_mode<synchronous>, transform_indices = @transform_3, window_bounds = array<i64: 8, 1>}, {transform_indices = @transform_4, window_bounds = array<i64: 8, 128>}]} {
    %c0 = arith.constant 0 : index
    %c0_0 = arith.constant 0 : index
    %0 = vector.load %arg2[%c0, %c0_0] : memref<8x128xf32, #tpu.memory_space<vmem>>, vector<8x128xf32>
    %cst = arith.constant 0.000000e+00 : f32
    %1 = vector.broadcast %cst : f32 to vector<8x128xf32>
    %2 = arith.maximumf %0, %1 : vector<8x128xf32>
    %c0_1 = arith.constant 0 : index
    %c0_2 = arith.constant 0 : index
    %3 = vector.load %arg3[%c0_1, %c0_2] : memref<8x8xf32, #tpu.memory_space<vmem>>, vector<8x8xf32>
    %cst_3 = arith.constant dense<0.000000e+00> : vector<8x128xf32>
    %4 = tpu.matmul %3, %2, %cst_3 {dimension_numbers = #tpu.dot_dimension_numbers<[1], [0], [0], [1], [0, 0, 1, 1], [], []>} : vector<8x8xf32>, vector<8x128xf32>, vector<8x128xf32> -> vector<8x128xf32>
    %c0_i32 = arith.constant 0 : i32
    %5 = arith.cmpi eq, %arg0, %c0_i32 : i32
    %c0_i32_4 = arith.constant 0 : i32
    %6 = arith.cmpi eq, %arg1, %c0_i32_4 : i32
    %7 = arith.andi %5, %6 : i1
    %8 = arith.extui %7 : i1 to i32
    %c0_i32_5 = arith.constant 0 : i32
    %9 = arith.cmpi ne, %8, %c0_i32_5 : i32
    scf.if %9 {
      %cst_9 = arith.constant 0.000000e+00 : f32
      %16 = vector.broadcast %cst_9 : f32 to vector<8x1xf32>
      %c0_10 = arith.constant 0 : index
      %c0_11 = arith.constant 0 : index
      %17 = vector.load %arg7[%c0_10, %c0_11] : memref<8x1xf32, #tpu.memory_space<vmem>>, vector<8x1xf32>
      tpu.vector_store %arg7[%c0_10, %c0_11], %16 {strides = array<i32>} : memref<8x1xf32, #tpu.memory_space<vmem>>, vector<8x1xf32>,
      %cst_12 = arith.constant 0.000000e+00 : f32
      %18 = vector.broadcast %cst_12 : f32 to vector<8x1xf32>
      %c0_13 = arith.constant 0 : index
      %c0_14 = arith.constant 0 : index
      %19 = vector.load %arg8[%c0_13, %c0_14] : memref<8x1xf32, #tpu.memory_space<vmem>>, vector<8x1xf32>
      tpu.vector_store %arg8[%c0_13, %c0_14], %18 {strides = array<i32>} : memref<8x1xf32, #tpu.memory_space<vmem>>, vector<8x1xf32>,
    } else {
    }
    %c0_i32_6 = arith.constant 0 : i32
    %10 = arith.cmpi eq, %arg0, %c0_i32_6 : i32
    %11 = arith.extui %10 : i1 to i32
    %c0_i32_7 = arith.constant 0 : i32
    %12 = arith.cmpi ne, %11, %c0_i32_7 : i32
    scf.if %12 {
      %c0_9 = arith.constant 0 : index
      %c0_10 = arith.constant 0 : index
      %16 = vector.load %arg7[%c0_9, %c0_10] : memref<8x1xf32, #tpu.memory_space<vmem>>, vector<8x1xf32>
      %cst_11 = arith.constant dense<0.000000e+00> : vector<8xf32>
      %17 = vector.multi_reduction <add>, %4, %cst_11 [1] : vector<8x128xf32> to vector<8xf32>
      %18 = vector.shape_cast %17 : vector<8xf32> to vector<8x1xf32>
      %19 = arith.addf %16, %18 : vector<8x1xf32>
      %c0_12 = arith.constant 0 : index
      %c0_13 = arith.constant 0 : index
      %20 = vector.load %arg7[%c0_12, %c0_13] : memref<8x1xf32, #tpu.memory_space<vmem>>, vector<8x1xf32>
      tpu.vector_store %arg7[%c0_12, %c0_13], %19 {strides = array<i32>} : memref<8x1xf32, #tpu.memory_space<vmem>>, vector<8x1xf32>,
      %c0_14 = arith.constant 0 : index
      %c0_15 = arith.constant 0 : index
      %21 = vector.load %arg8[%c0_14, %c0_15] : memref<8x1xf32, #tpu.memory_space<vmem>>, vector<8x1xf32>
      %22 = arith.mulf %4, %4 : vector<8x128xf32>
      %cst_16 = arith.constant dense<0.000000e+00> : vector<8xf32>
      %23 = vector.multi_reduction <add>, %22, %cst_16 [1] : vector<8x128xf32> to vector<8xf32>
      %24 = vector.shape_cast %23 : vector<8xf32> to vector<8x1xf32>
      %25 = arith.addf %21, %24 : vector<8x1xf32>
      %c0_17 = arith.constant 0 : index
      %c0_18 = arith.constant 0 : index
      %26 = vector.load %arg8[%c0_17, %c0_18] : memref<8x1xf32, #tpu.memory_space<vmem>>, vector<8x1xf32>
      tpu.vector_store %arg8[%c0_17, %c0_18], %25 {strides = array<i32>} : memref<8x1xf32, #tpu.memory_space<vmem>>, vector<8x1xf32>,
    } else {
    }
    %c1_i32 = arith.constant 1 : i32
    %13 = arith.cmpi eq, %arg0, %c1_i32 : i32
    %14 = arith.extui %13 : i1 to i32
    %c0_i32_8 = arith.constant 0 : i32
    %15 = arith.cmpi ne, %14, %c0_i32_8 : i32
    scf.if %15 {
      %c0_9 = arith.constant 0 : index
      %c0_10 = arith.constant 0 : index
      %16 = vector.load %arg7[%c0_9, %c0_10] : memref<8x1xf32, #tpu.memory_space<vmem>>, vector<8x1xf32>
      %cst_11 = arith.constant 7.812500e-03 : f32
      %17 = vector.broadcast %cst_11 : f32 to vector<8x1xf32>
      %18 = arith.mulf %16, %17 : vector<8x1xf32>
      %c0_12 = arith.constant 0 : index
      %c0_13 = arith.constant 0 : index
      %19 = vector.load %arg8[%c0_12, %c0_13] : memref<8x1xf32, #tpu.memory_space<vmem>>, vector<8x1xf32>
      %cst_14 = arith.constant 7.812500e-03 : f32
      %20 = vector.broadcast %cst_14 : f32 to vector<8x1xf32>
      %21 = arith.mulf %19, %20 : vector<8x1xf32>
      %22 = arith.mulf %18, %18 : vector<8x1xf32>
      %23 = arith.subf %21, %22 : vector<8x1xf32>
      %cst_15 = arith.constant 0.000000e+00 : f32
      %24 = vector.broadcast %cst_15 : f32 to vector<8x1xf32>
      %25 = arith.maximumf %23, %24 : vector<8x1xf32>
      %c0_16 = arith.constant 0 : index
      %c0_17 = arith.constant 0 : index
      %26 = vector.load %arg4[%c0_16, %c0_17] : memref<8x1xf32, #tpu.memory_space<vmem>>, vector<8x1xf32>
      %cst_18 = arith.constant 9.99999974E-6 : f32
      %27 = vector.broadcast %cst_18 : f32 to vector<8x1xf32>
      %28 = arith.addf %25, %27 : vector<8x1xf32>
      %29 = math.rsqrt %28 : vector<8x1xf32>
      %30 = arith.mulf %26, %29 : vector<8x1xf32>
      %c0_19 = arith.constant 0 : index
      %c0_20 = arith.constant 0 : index
      %31 = vector.load %arg5[%c0_19, %c0_20] : memref<8x1xf32, #tpu.memory_space<vmem>>, vector<8x1xf32>
      %32 = arith.mulf %18, %30 : vector<8x1xf32>
      %33 = arith.subf %31, %32 : vector<8x1xf32>
      %34 = vector.broadcast %30 : vector<8x1xf32> to vector<8x128xf32>
      %35 = arith.mulf %4, %34 : vector<8x128xf32>
      %36 = vector.broadcast %33 : vector<8x1xf32> to vector<8x128xf32>
      %37 = arith.addf %35, %36 : vector<8x128xf32>
      %c0_21 = arith.constant 0 : index
      %c0_22 = arith.constant 0 : index
      %38 = vector.load %arg6[%c0_21, %c0_22] : memref<8x128xf32, #tpu.memory_space<vmem>>, vector<8x128xf32>
      tpu.vector_store %arg6[%c0_21, %c0_22], %37 {strides = array<i32>} : memref<8x128xf32, #tpu.memory_space<vmem>>, vector<8x128xf32>,
    } else {
    }
    return
  }
  func.func @transform_0(%arg0: i32, %arg1: i32) -> (i32, i32) {
    %c0_i32 = arith.constant 0 : i32
    %c0_i32_0 = arith.constant 0 : i32
    return %c0_i32, %arg1 : i32, i32
  }
  func.func @transform_1(%arg0: i32, %arg1: i32) -> (i32, i32) {
    %c0_i32 = arith.constant 0 : i32
    %c0_i32_0 = arith.constant 0 : i32
    %c0_i32_1 = arith.constant 0 : i32
    return %c0_i32, %c0_i32_0 : i32, i32
  }
  func.func @transform_2(%arg0: i32, %arg1: i32) -> (i32, i32) {
    %c0_i32 = arith.constant 0 : i32
    %c0_i32_0 = arith.constant 0 : i32
    %c0_i32_1 = arith.constant 0 : i32
    return %c0_i32, %c0_i32_0 : i32, i32
  }
  func.func @transform_3(%arg0: i32, %arg1: i32) -> (i32, i32) {
    %c0_i32 = arith.constant 0 : i32
    %c0_i32_0 = arith.constant 0 : i32
    %c0_i32_1 = arith.constant 0 : i32
    return %c0_i32, %c0_i32_0 : i32, i32
  }
  func.func @transform_4(%arg0: i32, %arg1: i32) -> (i32, i32) {
    %0 = arith.muli %arg1, %arg0 : i32
    %c0_i32 = arith.constant 0 : i32
    %c0_i32_0 = arith.constant 0 : i32
    return %c0_i32, %0 : i32, i32
  }
}

</mosaic_0001>

<bundles_post_ra>
// kernel: tpu_custom_call.1
= control target key start
LH: loop header
LB: loop body
LE: loop exit
PB: predicated region body
PF: predicated region fallthrough
CT: control target
= control target key end

     0   :  { %9 = vsyncpa [#allocation5], 0  ;;  %s579_s0 = inlined_call_operand.vmem [shape: f32[8,128], index: 0, kind: input, shape index: {}]   ;;  %s580_s1 = inlined_call_operand.vmem [shape: f32[8,8], index: 1, kind: input, shape index: {}]   ;;  %s581_s2 = inlined_call_operand.vmem [shape: f32[8,1], index: 2, kind: input, shape index: {}]   ;;  %s582_s3 = inlined_call_operand.vmem [shape: f32[8,1], index: 3, kind: input, shape index: {}]   ;;  %s583_s4 = inlined_call_operand.hbm [shape: f32[8,128], index: 4, kind: output, shape index: {}]  }
   0x1   :  { %11 = vsyncpa [#allocation5 + $0x1], 0  ;;  %s525_s15 = smov 0   ;;  %s527_s16 = smov 0  }
   0x2   :  { %s529_s17 = smov 0  }
   0x3 LB: > { %s386_s18 = sadd.s32 4294967295, %s495_s17   ;;  %s387_s19 = sadd.s32 4294967294, %s495_s17   ;;  %s495_s17 = sphi %s529_s17, %s17_s17   ;;  %s491_s16 = sphi %s527_s16, %s585_s16   ;;  %s487_s15 = sphi %s525_s15, %s584_s15  }
   0x4   : > { %s29_s20 = sadd.s32 1, %s491_s16  ;;  %p390_p0 = scmp.ge.s32.totalorder %s495_s17, 1 }
   0x5   : > { %p31_p1 = scmp.ge.s32.totalorder %s29_s20, 2  ;;  %p178_p2 = scmp.lt.s32.totalorder %s495_s17, 3 }
   0x7   : > { %s587_s20 = smov (%p31_p1, %s29_s20), 0  ;;  %p179_p3 = pnand %p390_p0, %p178_p2 }
   0x8   : > { %p235_p4 = scmp.eq.s32.totalorder (!%p179_p3), %s487_s15, 0 }
   0x9   : > { %182 = sbr.rel (%p179_p3) target bundleno = 446 (0x1be), region = 36 }
   0xe   : > { %v208_v0 = vld [vmem:[%s579_s0] sm:$0xff]  ;;  %vm211_vm0 = vcmask 64512   ;;  %vm241_vm1 = vcmask (%p235_p4), 7168   ;;  %v497_v4 = vmov (%p235_p4), 0.0  }
   0xf   : > { %v209_v1 = vmax.f32 %v208_v0, 0.0  ;;  %v210_v2 = vld [vmem:[%s580_s1] sm:$0xff]  ;;  %242 = vst.msk [vmem:[#allocation2] sm:$0xff] (%p235_p4), %vm241_vm1, %v497_v4 }
  0x10   : > { %243 = vst.msk [vmem:[#allocation3] sm:$0xff] (%p235_p4), %vm241_vm1, %v497_v4 }
  0x11   : > { %230 = vmatpush.msra.mxu0 %v209_v1 }
  0x12   : > { %391 = vmatmul.msk.f32.vlgmr.msra.gmra.mxu0 %vm211_vm0, %v210_v2 }
  0x8b   : > { %240 = sbr.rel (!%p235_p4) target bundleno = 144 (0x90), region = 40 }
  0x8f   : > { %v232_v3 = vpop.f32.mrf.mxu0 }
  0x90 PF: > { %p393_p5 = scmp.ne.s32.totalorder %s487_s15, 0 }
  0x92   : > { %246 = sbr.rel (%p393_p5) target bundleno = 278 (0x116), region = 44 }
  0x97   : > { %248 = vadd.xlane.f32.xlu0 %v232_v3  ;;  %v254_v5 = vmul.f32 %v232_v3, %v232_v3  ;;  %v247_v6 = vld [vmem:[#allocation2] sm:$0xff]  ;;  %vm251_vm2 = vcmask 7168   ;;  %v253_v9 = vld [vmem:[#allocation3] sm:$0xff] }
  0x9f   : > { %255 = vadd.xlane.f32.xlu0 %v254_v5 }
 0x10a   : > { %v249_v7 = vpop.xlane.xlu0 %248 }
 0x10b   : > { %v250_v8 = vadd.f32 %v249_v7, %v247_v6 }
 0x10d   : > { %252 = vst.msk [vmem:[#allocation2] sm:$0xff] %vm251_vm2, %v250_v8 }
 0x112   : > { %v256_v10 = vpop.xlane.xlu0 %255 }
 0x113   : > { %v257_v11 = vadd.f32 %v256_v10, %v253_v9 }
 0x115   : > { %258 = vst.msk [vmem:[#allocation3] sm:$0xff] %vm251_vm2, %v257_v11 }
 0x116 PF: > { %p394_p6 = scmp.ne.s32.totalorder %s487_s15, 1 }
 0x118   : > { %262 = sbr.rel (%p394_p6) target bundleno = 442 (0x1ba), region = 48 }
 0x11d   : > { %v263_v12 = vld [vmem:[#allocation2] sm:$0xff]  ;;  %v265_v13 = vld [vmem:[#allocation3] sm:$0xff]  ;;  %v498_v14 = vmov 0  }
 0x11e   : > { %438 = vset.pattern.permute.xlu0 %v498_v14  ;;  %v264_v15 = vmul.f32 0.0078125, %v263_v12  ;;  %v266_v16 = vmul.f32 0.0078125, %v265_v13  ;;  %v270_v26 = vld [vmem:[%s581_s2] sm:$0xff] }
 0x11f   : > { %v283_v31 = vld [vmem:[%s582_s3] sm:$0xff] }
 0x120   : > { %v267_v17 = vmul.f32 %v264_v15, %v264_v15 }
 0x122   : > { %v268_v18 = vsub.f32 %v266_v16, %v267_v17 }
 0x124   : > { %v269_v19 = vmax.f32 %v268_v18, 0.0 }
 0x126   : > { %v271_v20 = vadd.f32 1e-05, %v269_v19 }
 0x128   : > { %439 = vrsqrt.f32 %v271_v20  ;;  %vm278_vm3 = vweird.f32 %v271_v20 }
 0x12e   : > { %v440_v21 = vpop.eup %439 }
 0x12f   : > { %v273_v22 = vmul.f32 %v440_v21, %v271_v20  ;;  %vm279_vm4 = vweird.f32 %v440_v21 }
 0x130   : > { %vm280_vm5 = vmor %vm278_vm3, %vm279_vm4 }
 0x131   : > { %v274_v23 = vmul.f32 %v440_v21, %v273_v22 }
 0x133   : > { %v275_v24 = vmul.f32 0.5, %v274_v23 }
 0x135   : > { %v276_v25 = vsub.f32 1.5, %v275_v24 }
 0x137   : > { %v277_v27 = vmul.f32 %v440_v21, %v276_v25 }
 0x139   : > { %v281_v28 = vsel %vm280_vm5, %v440_v21, %v277_v27 }
 0x13a   : > { %v282_v29 = vmul.f32 %v281_v28, %v270_v26 }
 0x13c   : > { %288 = vperm.xlu0 %438, %v282_v29   ;;  %v284_v30 = vmul.f32 %v282_v29, %v264_v15 }
 0x13e   : > { %v285_v32 = vsub.f32 %v283_v31, %v284_v30 }
 0x144   : > { %294 = vperm.xlu0 %438, %v285_v32  }
 0x1ae   : > { %v289_v33 = vpop.permute.xlu0 %288 }
 0x1af   : > { %v291_v34 = vmul.f32 %v289_v33, %v232_v3 }
 0x1b6   : > { %v295_v35 = vpop.permute.xlu0 %294 }
 0x1b7   : > { %v297_v36 = vadd.f32 %v295_v35, %v291_v34 }
 0x1b9   : > { %298 = vst [vmem:[#allocation4] sm:$0xff] %v297_v36 }
 0x1ba PF: > { %p408_p7 = scmp.eq.s32.totalorder %s386_s18, 1  ;;  %s315_s5 = sshll.u32 %s583_s4, 4  ;;  %s316_s5 = int_to_ptr.hbm [resolvable:$true] %s315_s5 }
 0x1bb   : > { %s499_s6 = smov [#allocation4]  }
 0x1bc   : > { %s313_s7 = sshll.u32 %s499_s6, 4  ;;  %s314_s7 = int_to_ptr.vmem [resolvable:$true] %s313_s7 }
 0x1bd   : > { %401 = dma.vmem_to_hbm [thread:$0]  (%p408_p7), %s314_s7, 128, %s316_s5, [#allocation5]  }
 0x1be PF: > { %p409_p8 = scmp.ge.s32.totalorder %s495_s17, 2  ;;  %p410_p9 = scmp.eq.s32.totalorder %s387_s19, 1 }
 0x1c0   : > { %p405_p10 = pnand %p410_p9, %p409_p8 }
 0x1c2   : > { %p406_p11 = pneg %p405_p10 }
 0x1c4   : > { %482 = dma.done.wait (%p406_p11), [#allocation5], 128  }
 0x1c5   : > { %484 = vsyncadd (%p406_p11), [#allocation5], 4294967168  ;;  %s17_s17 = sadd.s32 1, %s495_s17   ;;  %s584_s15 = smov %s491_s16 }
 0x1c6   : > { %p14_p12 = scmp.ge.s32.totalorder %s17_s17, 4   ;;  %s585_s16 = smov %s587_s20 }
 0x1c8   :  { %16 = sbr.rel (!%p14_p12) target bundleno = 3 (0x3), region = 83 }
 0x1cd   :  { %334 = vsyncpa [#allocation5], 1 }
 0x1ce   :  { %336 = vsyncpa [#allocation5 + $0x1], 1 }

</bundles_post_ra>
